<compile_context>
chip_gen: v6e
topology: v6e:2x2x1
jax: 0.10.0
libtpu: 0.0.40
codegen_flags: <defaults>
</compile_context>

<pallas_src>
import jax
import jax.numpy as jnp
from jax.experimental import pallas as pl
from jax.experimental.pallas import tpu as pltpu

LN_EPS = 1e-5        # PyTorch nn.LayerNorm default
LANE = 128
SUBLANE = 8
MAX_BATCH_TILE = 256


def _round_up(a, b):
    return ((a + b - 1) // b) * b


def _make_fused_mlp_kernel(num_hidden):
    """Kernel: num_hidden x (Linear + LayerNorm + ReLU) then a final Linear."""

    def kernel(*refs):
        x_ref = refs[0]
        o_ref = refs[-1]
        h = x_ref[...].astype(jnp.float32)
        idx = 1
        for _ in range(num_hidden):
            w_ref, b_ref, g_ref, beta_ref = refs[idx:idx + 4]
            idx += 4
            # Linear: bf16 operands on the MXU, f32 accumulation.
            y = jnp.dot(h.astype(w_ref.dtype), w_ref[...],
                        preferred_element_type=jnp.float32)
            y = y + b_ref[...]
            # LayerNorm, single-pass stats (biased variance, like PyTorch).
            m = jnp.mean(y, axis=-1, keepdims=True)
            m2 = jnp.mean(y * y, axis=-1, keepdims=True)
            var = m2 - m * m
            y = (y - m) * jax.lax.rsqrt(var + LN_EPS)
            y = y * g_ref[...] + beta_ref[...]
            # ReLU; Dropout(0.1) is identity in eval mode.
            h = jnp.maximum(y, 0.0)
            # TODO(synk): training-mode dropout (random masking) not implemented.
        w_ref, b_ref = refs[idx], refs[idx + 1]
        y = jnp.dot(h.astype(w_ref.dtype), w_ref[...],
                    preferred_element_type=jnp.float32)
        o_ref[...] = (y + b_ref[...]).astype(o_ref.dtype)

    return kernel


def fused_mlp(x, params):
    """Fused forward pass. x: (N, D_in) f32.  params: ((w,b,g,beta)*H, (w,b))."""
    num_hidden = len(params) - 1
    flat = []
    for layer in params[:-1]:
        flat.extend(layer)
    flat.extend(params[-1])

    d_in_pad = params[0][0].shape[0]        # first weight is already lane-padded
    out_dim = params[-1][0].shape[1]

    n = x.shape[0]
    n_rows = _round_up(n, SUBLANE)
    tm = min(n_rows, MAX_BATCH_TILE)
    n_rows = _round_up(n_rows, tm)
    n_tiles = n_rows // tm

    # Zero-pad batch rows (sliced off afterwards) and input features (the
    # matching first-layer weight rows are zero, so the result is unchanged).
    x_pad = jnp.zeros((n_rows, d_in_pad), jnp.float32)
    x_pad = x_pad.at[:n, :x.shape[1]].set(x.astype(jnp.float32))

    kernel = _make_fused_mlp_kernel(num_hidden)
    out_shape = jax.ShapeDtypeStruct((n_rows, out_dim), jnp.float32)

    flops = 2 * n_rows * sum(
        layer[0].shape[0] * layer[0].shape[1] for layer in params)
    bytes_accessed = (
        x_pad.size * x_pad.dtype.itemsize
        + sum(a.size * a.dtype.itemsize for a in flat)
        + n_rows * out_dim * 4)
    cost = pl.CostEstimate(flops=flops,
                           transcendentals=n_rows * num_hidden,
                           bytes_accessed=bytes_accessed)

    if n_tiles == 1:
        # Single tile: no grid, no pipeline bookkeeping; whole arrays in VMEM.
        out = pl.pallas_call(
            kernel,
            out_shape=out_shape,
            cost_estimate=cost,
        )(x_pad, *flat)
    else:
        # Batch-tiled grid; "parallel" lets v7x split tiles across its two
        # TensorCores.  Constant index_maps keep weights/biases VMEM-resident.
        def _const_spec(arr):
            nd = arr.ndim
            return pl.BlockSpec(arr.shape, lambda i, _nd=nd: (0,) * _nd)

        in_specs = [pl.BlockSpec((tm, d_in_pad), lambda i: (i, 0))]
        in_specs += [_const_spec(a) for a in flat]
        out_specs = pl.BlockSpec((tm, out_dim), lambda i: (i, 0))
        out = pl.pallas_call(
            kernel,
            out_shape=out_shape,
            grid=(n_tiles,),
            in_specs=in_specs,
            out_specs=out_specs,
            cost_estimate=cost,
            compiler_params=pltpu.CompilerParams(
                dimension_semantics=("parallel",)),
        )(x_pad, *flat)

    return out[:n]


def init_params(key, input_dim, hidden_dims, output_dim):
    """PyTorch-style uniform init.  Weights stored in bf16 (MXU operands);
    bias / LayerNorm affine kept in f32.  First layer's input dim is padded
    to a multiple of 128 lanes with zero rows (numerically a no-op)."""
    params = []
    prev = input_dim
    prev_pad = _round_up(input_dim, LANE)
    dims = list(hidden_dims) + [output_dim]
    for i, d in enumerate(dims):
        key, kw, kb = jax.random.split(key, 3)
        bound = 1.0 / (prev ** 0.5)
        w = jax.random.uniform(kw, (prev, d), jnp.float32, -bound, bound)
        if prev_pad != prev:
            w = jnp.zeros((prev_pad, d), jnp.float32).at[:prev].set(w)
        w = w.astype(jnp.bfloat16)
        b = jax.random.uniform(kb, (1, d), jnp.float32, -bound, bound)
        if i < len(hidden_dims):
            gamma = jnp.ones((1, d), jnp.float32)
            beta = jnp.zeros((1, d), jnp.float32)
            params.append((w, b, gamma, beta))
        else:
            params.append((w, b))
        prev = d
        prev_pad = d   # hidden dims of this module are already lane-aligned
    return tuple(params)


def reference_forward(x, params):
    """Pure-JAX reference mirroring the kernel precision (bf16 matmul operands,
    f32 accumulation, f32 LayerNorm, same single-pass variance formula)."""
    h = x.astype(jnp.float32)
    for w, b, gamma, beta in params[:-1]:
        w_eff = w[:h.shape[1]]                  # drop zero-padded rows (no-op)
        y = jnp.dot(h.astype(jnp.bfloat16), w_eff,
                    preferred_element_type=jnp.float32) + b
        m = jnp.mean(y, axis=-1, keepdims=True)
        m2 = jnp.mean(y * y, axis=-1, keepdims=True)
        y = (y - m) * jax.lax.rsqrt(m2 - m * m + LN_EPS)
        y = y * gamma + beta
        h = jnp.maximum(y, 0.0)
    w, b = params[-1]
    return jnp.dot(h.astype(jnp.bfloat16), w,
                   preferred_element_type=jnp.float32) + b


if __name__ == "__main__":
    # Small shapes consistent with the module structure:
    # 3 hidden [Linear -> LayerNorm -> ReLU -> Dropout] blocks + final Linear.
    batch = 8
    input_dim = 64
    hidden_dims = [128, 256, 512]
    output_dim = 512

    key = jax.random.PRNGKey(0)
    key, kx = jax.random.split(key)
    x = jax.random.normal(kx, (batch, input_dim), jnp.float32)
    params = init_params(key, input_dim, hidden_dims, output_dim)

    fwd = jax.jit(fused_mlp)
    out = jax.block_until_ready(fwd(x, params))

    ref = reference_forward(x, params)
    assert out.shape == (batch, output_dim), out.shape
    max_err = float(jnp.max(jnp.abs(out - ref)))
    assert max_err < 1e-2, max_err

    print("KERNEL_OK")
</pallas_src>

<mosaic_0001>
module attributes {stable_mosaic.version = 11 : i64} {
  func.func @kernel(%arg0: memref<8x128xf32, #tpu.memory_space<vmem>>, %arg1: memref<128x128xbf16, #tpu.memory_space<vmem>>, %arg2: memref<1x128xf32, #tpu.memory_space<vmem>>, %arg3: memref<1x128xf32, #tpu.memory_space<vmem>>, %arg4: memref<1x128xf32, #tpu.memory_space<vmem>>, %arg5: memref<128x256xbf16, #tpu.memory_space<vmem>>, %arg6: memref<1x256xf32, #tpu.memory_space<vmem>>, %arg7: memref<1x256xf32, #tpu.memory_space<vmem>>, %arg8: memref<1x256xf32, #tpu.memory_space<vmem>>, %arg9: memref<256x512xbf16, #tpu.memory_space<vmem>>, %arg10: memref<1x512xf32, #tpu.memory_space<vmem>>, %arg11: memref<1x512xf32, #tpu.memory_space<vmem>>, %arg12: memref<1x512xf32, #tpu.memory_space<vmem>>, %arg13: memref<512x512xbf16, #tpu.memory_space<vmem>>, %arg14: memref<1x512xf32, #tpu.memory_space<vmem>>, %arg15: memref<8x512xf32, #tpu.memory_space<vmem>>) attributes {dimension_semantics = [], scalar_prefetch = 0 : i64, scratch_operands = 0 : i64, tpu.core_type = #tpu.core_type<tc>} {
    %c0 = arith.constant 0 : index
    %c0_0 = arith.constant 0 : index
    %0 = vector.load %arg0[%c0, %c0_0] : memref<8x128xf32, #tpu.memory_space<vmem>>, vector<8x128xf32>
    %1 = arith.truncf %0 : vector<8x128xf32> to vector<8x128xbf16>
    %c0_1 = arith.constant 0 : index
    %c0_2 = arith.constant 0 : index
    %2 = vector.load %arg1[%c0_1, %c0_2] : memref<128x128xbf16, #tpu.memory_space<vmem>>, vector<128x128xbf16>
    %cst = arith.constant dense<0.000000e+00> : vector<8x128xf32>
    %3 = tpu.matmul %1, %2, %cst {dimension_numbers = #tpu.dot_dimension_numbers<[1], [0], [0], [1], [0, 0, 1, 1], [], []>} : vector<8x128xbf16>, vector<128x128xbf16>, vector<8x128xf32> -> vector<8x128xf32>
    %c0_3 = arith.constant 0 : index
    %c0_4 = arith.constant 0 : index
    %4 = vector.load %arg2[%c0_3, %c0_4] : memref<1x128xf32, #tpu.memory_space<vmem>>, vector<1x128xf32>
    %5 = vector.broadcast %4 : vector<1x128xf32> to vector<8x128xf32>
    %6 = arith.addf %3, %5 : vector<8x128xf32>
    %cst_5 = arith.constant dense<0.000000e+00> : vector<8xf32>
    %7 = vector.multi_reduction <add>, %6, %cst_5 [1] : vector<8x128xf32> to vector<8xf32>
    %8 = vector.shape_cast %7 : vector<8xf32> to vector<8x1xf32>
    %cst_6 = arith.constant 1.280000e+02 : f32
    %9 = vector.broadcast %cst_6 : f32 to vector<8x1xf32>
    %10 = arith.divf %8, %9 : vector<8x1xf32>
    %11 = arith.mulf %6, %6 : vector<8x128xf32>
    %cst_7 = arith.constant dense<0.000000e+00> : vector<8xf32>
    %12 = vector.multi_reduction <add>, %11, %cst_7 [1] : vector<8x128xf32> to vector<8xf32>
    %13 = vector.shape_cast %12 : vector<8xf32> to vector<8x1xf32>
    %cst_8 = arith.constant 1.280000e+02 : f32
    %14 = vector.broadcast %cst_8 : f32 to vector<8x1xf32>
    %15 = arith.divf %13, %14 : vector<8x1xf32>
    %16 = arith.mulf %10, %10 : vector<8x1xf32>
    %17 = arith.subf %15, %16 : vector<8x1xf32>
    %18 = vector.broadcast %10 : vector<8x1xf32> to vector<8x128xf32>
    %19 = arith.subf %6, %18 : vector<8x128xf32>
    %cst_9 = arith.constant 9.99999974E-6 : f32
    %20 = vector.broadcast %cst_9 : f32 to vector<8x1xf32>
    %21 = arith.addf %17, %20 : vector<8x1xf32>
    %22 = math.rsqrt %21 : vector<8x1xf32>
    %23 = vector.broadcast %22 : vector<8x1xf32> to vector<8x128xf32>
    %24 = arith.mulf %19, %23 : vector<8x128xf32>
    %c0_10 = arith.constant 0 : index
    %c0_11 = arith.constant 0 : index
    %25 = vector.load %arg3[%c0_10, %c0_11] : memref<1x128xf32, #tpu.memory_space<vmem>>, vector<1x128xf32>
    %26 = vector.broadcast %25 : vector<1x128xf32> to vector<8x128xf32>
    %27 = arith.mulf %24, %26 : vector<8x128xf32>
    %c0_12 = arith.constant 0 : index
    %c0_13 = arith.constant 0 : index
    %28 = vector.load %arg4[%c0_12, %c0_13] : memref<1x128xf32, #tpu.memory_space<vmem>>, vector<1x128xf32>
    %29 = vector.broadcast %28 : vector<1x128xf32> to vector<8x128xf32>
    %30 = arith.addf %27, %29 : vector<8x128xf32>
    %cst_14 = arith.constant 0.000000e+00 : f32
    %31 = vector.broadcast %cst_14 : f32 to vector<8x128xf32>
    %32 = arith.maximumf %30, %31 : vector<8x128xf32>
    %33 = arith.truncf %32 : vector<8x128xf32> to vector<8x128xbf16>
    %c0_15 = arith.constant 0 : index
    %c0_16 = arith.constant 0 : index
    %34 = vector.load %arg5[%c0_15, %c0_16] : memref<128x256xbf16, #tpu.memory_space<vmem>>, vector<128x256xbf16>
    %cst_17 = arith.constant dense<0.000000e+00> : vector<8x256xf32>
    %35 = tpu.matmul %33, %34, %cst_17 {dimension_numbers = #tpu.dot_dimension_numbers<[1], [0], [0], [1], [0, 0, 1, 1], [], []>} : vector<8x128xbf16>, vector<128x256xbf16>, vector<8x256xf32> -> vector<8x256xf32>
    %c0_18 = arith.constant 0 : index
    %c0_19 = arith.constant 0 : index
    %36 = vector.load %arg6[%c0_18, %c0_19] : memref<1x256xf32, #tpu.memory_space<vmem>>, vector<1x256xf32>
    %37 = vector.broadcast %36 : vector<1x256xf32> to vector<8x256xf32>
    %38 = arith.addf %35, %37 : vector<8x256xf32>
    %cst_20 = arith.constant dense<0.000000e+00> : vector<8xf32>
    %39 = vector.multi_reduction <add>, %38, %cst_20 [1] : vector<8x256xf32> to vector<8xf32>
    %40 = vector.shape_cast %39 : vector<8xf32> to vector<8x1xf32>
    %cst_21 = arith.constant 2.560000e+02 : f32
    %41 = vector.broadcast %cst_21 : f32 to vector<8x1xf32>
    %42 = arith.divf %40, %41 : vector<8x1xf32>
    %43 = arith.mulf %38, %38 : vector<8x256xf32>
    %cst_22 = arith.constant dense<0.000000e+00> : vector<8xf32>
    %44 = vector.multi_reduction <add>, %43, %cst_22 [1] : vector<8x256xf32> to vector<8xf32>
    %45 = vector.shape_cast %44 : vector<8xf32> to vector<8x1xf32>
    %cst_23 = arith.constant 2.560000e+02 : f32
    %46 = vector.broadcast %cst_23 : f32 to vector<8x1xf32>
    %47 = arith.divf %45, %46 : vector<8x1xf32>
    %48 = arith.mulf %42, %42 : vector<8x1xf32>
    %49 = arith.subf %47, %48 : vector<8x1xf32>
    %50 = vector.broadcast %42 : vector<8x1xf32> to vector<8x256xf32>
    %51 = arith.subf %38, %50 : vector<8x256xf32>
    %cst_24 = arith.constant 9.99999974E-6 : f32
    %52 = vector.broadcast %cst_24 : f32 to vector<8x1xf32>
    %53 = arith.addf %49, %52 : vector<8x1xf32>
    %54 = math.rsqrt %53 : vector<8x1xf32>
    %55 = vector.broadcast %54 : vector<8x1xf32> to vector<8x256xf32>
    %56 = arith.mulf %51, %55 : vector<8x256xf32>
    %c0_25 = arith.constant 0 : index
    %c0_26 = arith.constant 0 : index
    %57 = vector.load %arg7[%c0_25, %c0_26] : memref<1x256xf32, #tpu.memory_space<vmem>>, vector<1x256xf32>
    %58 = vector.broadcast %57 : vector<1x256xf32> to vector<8x256xf32>
    %59 = arith.mulf %56, %58 : vector<8x256xf32>
    %c0_27 = arith.constant 0 : index
    %c0_28 = arith.constant 0 : index
    %60 = vector.load %arg8[%c0_27, %c0_28] : memref<1x256xf32, #tpu.memory_space<vmem>>, vector<1x256xf32>
    %61 = vector.broadcast %60 : vector<1x256xf32> to vector<8x256xf32>
    %62 = arith.addf %59, %61 : vector<8x256xf32>
    %cst_29 = arith.constant 0.000000e+00 : f32
    %63 = vector.broadcast %cst_29 : f32 to vector<8x256xf32>
    %64 = arith.maximumf %62, %63 : vector<8x256xf32>
    %65 = arith.truncf %64 : vector<8x256xf32> to vector<8x256xbf16>
    %c0_30 = arith.constant 0 : index
    %c0_31 = arith.constant 0 : index
    %66 = vector.load %arg9[%c0_30, %c0_31] : memref<256x512xbf16, #tpu.memory_space<vmem>>, vector<256x512xbf16>
    %cst_32 = arith.constant dense<0.000000e+00> : vector<8x512xf32>
    %67 = tpu.matmul %65, %66, %cst_32 {dimension_numbers = #tpu.dot_dimension_numbers<[1], [0], [0], [1], [0, 0, 1, 1], [], []>} : vector<8x256xbf16>, vector<256x512xbf16>, vector<8x512xf32> -> vector<8x512xf32>
    %c0_33 = arith.constant 0 : index
    %c0_34 = arith.constant 0 : index
    %68 = vector.load %arg10[%c0_33, %c0_34] : memref<1x512xf32, #tpu.memory_space<vmem>>, vector<1x512xf32>
    %69 = vector.broadcast %68 : vector<1x512xf32> to vector<8x512xf32>
    %70 = arith.addf %67, %69 : vector<8x512xf32>
    %cst_35 = arith.constant dense<0.000000e+00> : vector<8xf32>
    %71 = vector.multi_reduction <add>, %70, %cst_35 [1] : vector<8x512xf32> to vector<8xf32>
    %72 = vector.shape_cast %71 : vector<8xf32> to vector<8x1xf32>
    %cst_36 = arith.constant 5.120000e+02 : f32
    %73 = vector.broadcast %cst_36 : f32 to vector<8x1xf32>
    %74 = arith.divf %72, %73 : vector<8x1xf32>
    %75 = arith.mulf %70, %70 : vector<8x512xf32>
    %cst_37 = arith.constant dense<0.000000e+00> : vector<8xf32>
    %76 = vector.multi_reduction <add>, %75, %cst_37 [1] : vector<8x512xf32> to vector<8xf32>
    %77 = vector.shape_cast %76 : vector<8xf32> to vector<8x1xf32>
    %cst_38 = arith.constant 5.120000e+02 : f32
    %78 = vector.broadcast %cst_38 : f32 to vector<8x1xf32>
    %79 = arith.divf %77, %78 : vector<8x1xf32>
    %80 = arith.mulf %74, %74 : vector<8x1xf32>
    %81 = arith.subf %79, %80 : vector<8x1xf32>
    %82 = vector.broadcast %74 : vector<8x1xf32> to vector<8x512xf32>
    %83 = arith.subf %70, %82 : vector<8x512xf32>
    %cst_39 = arith.constant 9.99999974E-6 : f32
    %84 = vector.broadcast %cst_39 : f32 to vector<8x1xf32>
    %85 = arith.addf %81, %84 : vector<8x1xf32>
    %86 = math.rsqrt %85 : vector<8x1xf32>
    %87 = vector.broadcast %86 : vector<8x1xf32> to vector<8x512xf32>
    %88 = arith.mulf %83, %87 : vector<8x512xf32>
    %c0_40 = arith.constant 0 : index
    %c0_41 = arith.constant 0 : index
    %89 = vector.load %arg11[%c0_40, %c0_41] : memref<1x512xf32, #tpu.memory_space<vmem>>, vector<1x512xf32>
    %90 = vector.broadcast %89 : vector<1x512xf32> to vector<8x512xf32>
    %91 = arith.mulf %88, %90 : vector<8x512xf32>
    %c0_42 = arith.constant 0 : index
    %c0_43 = arith.constant 0 : index
    %92 = vector.load %arg12[%c0_42, %c0_43] : memref<1x512xf32, #tpu.memory_space<vmem>>, vector<1x512xf32>
    %93 = vector.broadcast %92 : vector<1x512xf32> to vector<8x512xf32>
    %94 = arith.addf %91, %93 : vector<8x512xf32>
    %cst_44 = arith.constant 0.000000e+00 : f32
    %95 = vector.broadcast %cst_44 : f32 to vector<8x512xf32>
    %96 = arith.maximumf %94, %95 : vector<8x512xf32>
    %97 = arith.truncf %96 : vector<8x512xf32> to vector<8x512xbf16>
    %c0_45 = arith.constant 0 : index
    %c0_46 = arith.constant 0 : index
    %98 = vector.load %arg13[%c0_45, %c0_46] : memref<512x512xbf16, #tpu.memory_space<vmem>>, vector<512x512xbf16>
    %cst_47 = arith.constant dense<0.000000e+00> : vector<8x512xf32>
    %99 = tpu.matmul %97, %98, %cst_47 {dimension_numbers = #tpu.dot_dimension_numbers<[1], [0], [0], [1], [0, 0, 1, 1], [], []>} : vector<8x512xbf16>, vector<512x512xbf16>, vector<8x512xf32> -> vector<8x512xf32>
    %c0_48 = arith.constant 0 : index
    %c0_49 = arith.constant 0 : index
    %100 = vector.load %arg14[%c0_48, %c0_49] : memref<1x512xf32, #tpu.memory_space<vmem>>, vector<1x512xf32>
    %101 = vector.broadcast %100 : vector<1x512xf32> to vector<8x512xf32>
    %102 = arith.addf %99, %101 : vector<8x512xf32>
    %c0_50 = arith.constant 0 : index
    %c0_51 = arith.constant 0 : index
    %103 = vector.load %arg15[%c0_50, %c0_51] : memref<8x512xf32, #tpu.memory_space<vmem>>, vector<8x512xf32>
    tpu.vector_store %arg15[%c0_50, %c0_51], %102 {strides = array<i32>} : memref<8x512xf32, #tpu.memory_space<vmem>>, vector<8x512xf32>,
    return
  }
}

</mosaic_0001>

<bundles_post_ra>
// kernel: fused_mlp.1
= control target key start
LH: loop header
LB: loop body
LE: loop exit
PB: predicated region body
PF: predicated region fallthrough
CT: control target
= control target key end

     0   :  { %20 = vsyncpa [#allocation3], 0  ;;  %s2922_s0 = inlined_call_operand.vmem [shape: f32[8,128], index: 0, kind: input, shape index: {}]   ;;  %s2923_s1 = inlined_call_operand.hbm [shape: bf16[128,128], index: 1, kind: input, shape index: {}]   ;;  %s2924_s2 = inlined_call_operand.vmem [shape: f32[1,128], index: 2, kind: input, shape index: {}]   ;;  %s2925_s3 = inlined_call_operand.vmem [shape: f32[1,128], index: 3, kind: input, shape index: {}]   ;;  %s2926_s4 = inlined_call_operand.vmem [shape: f32[1,128], index: 4, kind: input, shape index: {}]   ;;  %s2927_s5 = inlined_call_operand.hbm [shape: bf16[128,256], index: 5, kind: input, shape index: {}]   ;;  %s2928_s6 = inlined_call_operand.vmem [shape: f32[1,256], index: 6, kind: input, shape index: {}]   ;;  %s2929_s7 = inlined_call_operand.vmem [shape: f32[1,256], index: 7, kind: input, shape index: {}]   ;;  %s2930_s8 = inlined_call_operand.vmem [shape: f32[1,256], index: 8, kind: input, shape index: {}]   ;;  %s2931_s9 = inlined_call_operand.hbm [shape: bf16[256,512], index: 9, kind: input, shape index: {}]   ;;  %s2932_s10 = inlined_call_operand.vmem [shape: f32[1,512], index: 10, kind: input, shape index: {}]   ;;  %s2933_s11 = inlined_call_operand.vmem [shape: f32[1,512], index: 11, kind: input, shape index: {}]   ;;  %s2934_s12 = inlined_call_operand.vmem [shape: f32[1,512], index: 12, kind: input, shape index: {}]   ;;  %s2935_s13 = inlined_call_operand.hbm [shape: bf16[512,512], index: 13, kind: input, shape index: {}]   ;;  %s2936_s14 = inlined_call_operand.vmem [shape: f32[1,512], index: 14, kind: input, shape index: {}]   ;;  %s2937_s15 = inlined_call_operand.hbm [shape: f32[8,512], index: 15, kind: output, shape index: {}]  }
   0x1   :  { %21 = vsyncpa [#allocation6], 0 }
   0x2   :  { %22 = vsyncpa [#allocation9], 0 }
   0x3   :  { %23 = vsyncpa [#allocation4], 0  ;;  %s2700_s18 = smov [#allocation5]  }
   0x4   :  { %s49_s19 = sshll.u32 %s2700_s18, 4  ;;  %s50_s19 = int_to_ptr.vmem [resolvable:$true] %s49_s19 }
   0x5   :  { %s2600_s20 = scalar_lea.vmem %s50_s19, 2048  ;;  %p2605_p1 = scmp.lt.s32.totalorder %s50_s19, %s50_s19 }
   0x6   :  { %p2601_p0 = scmp.ne.s32.totalorder %s50_s19, %s2600_s20  ;;  %p2606_p2 = scmp.lt.s32.totalorder %s2600_s20, %s2600_s20 }
   0x8   :  { %p2607_p3 = por %p2606_p2, %p2605_p1 }
   0xa   :  { %p2608_p4 = pnand %p2607_p3, %p2601_p0 }
   0xc   :  { %2611 = shalt.err (!%p2608_p4)
}
   0xd   :  { %s2701_s21 = smov 128   ;;  %s2702_s22 = smov 8  }
   0xe   :  { %55 = dma.hbm_to_vmem [thread:$0]  %s2927_s5, 2048, %s50_s19, [#allocation6], %s2701_s21, %s2701_s21, %s2702_s22  }
   0xf   :  { %s2703_s25 = smov [#allocation2]  }
  0x10   :  { %s31_s26 = sshll.u32 %s2703_s25, 4  ;;  %s32_s26 = int_to_ptr.vmem [resolvable:$true] %s31_s26 }
  0x11   :  { %s2620_s27 = scalar_lea.vmem %s32_s26, 1024  ;;  %p2625_p6 = scmp.lt.s32.totalorder %s32_s26, %s32_s26 }
  0x12   :  { %p2621_p5 = scmp.ne.s32.totalorder %s32_s26, %s2620_s27  ;;  %p2626_p7 = scmp.lt.s32.totalorder %s2620_s27, %s2620_s27 }
  0x14   :  { %p2627_p8 = por %p2626_p7, %p2625_p6 }
  0x16   :  { %p2628_p9 = pnand %p2627_p8, %p2621_p5 }
  0x18   :  { %2631 = shalt.err (!%p2628_p9)
}
  0x19   :  { %s2704_s28 = smov 64   ;;  %s2705_s29 = smov 4  }
  0x1a   :  { %37 = dma.hbm_to_vmem [thread:$0]  %s2923_s1, 1024, %s32_s26, [#allocation3], %s2704_s28, %s2704_s28, %s2705_s29  }
  0x1b   :  { %s2706_s17 = smov [#allocation7]  }
  0x1c   :  { %s67_s18 = sshll.u32 %s2706_s17, 4  ;;  %s68_s18 = int_to_ptr.vmem [resolvable:$true] %s67_s18 }
  0x1d   :  { %s2640_s5 = scalar_lea.vmem %s68_s18, 8192  ;;  %p2645_p11 = scmp.lt.s32.totalorder %s68_s18, %s68_s18 }
  0x1e   :  { %p2641_p10 = scmp.ne.s32.totalorder %s68_s18, %s2640_s5  ;;  %p2646_p12 = scmp.lt.s32.totalorder %s2640_s5, %s2640_s5 }
  0x20   :  { %p2647_p13 = por %p2646_p12, %p2645_p11 }
  0x22   :  { %p2648_p0 = pnand %p2647_p13, %p2641_p10 }
  0x24   :  { %2651 = shalt.err (!%p2648_p0)
}
  0x25   :  { %s2707_s19 = smov 256   ;;  %s2708_s20 = smov 16  }
  0x26   :  { %73 = dma.hbm_to_vmem [thread:$0]  %s2931_s9, 8192, %s68_s18, [#allocation6], %s2707_s19, %s2707_s19, %s2708_s20  }
  0x27   :  { %s2709_s23 = smov [#allocation8]  }
  0x28   :  { %s85_s24 = sshll.u32 %s2709_s23, 4  ;;  %s86_s24 = int_to_ptr.vmem [resolvable:$true] %s85_s24 }
  0x29   :  { %s2660_s1 = scalar_lea.vmem %s86_s24, 16384  ;;  %p2665_p2 = scmp.lt.s32.totalorder %s86_s24, %s86_s24 }
  0x2a   :  { %p2661_p1 = scmp.ne.s32.totalorder %s86_s24, %s2660_s1  ;;  %p2666_p3 = scmp.lt.s32.totalorder %s2660_s1, %s2660_s1 }
  0x2c   :  { %p2667_p4 = por %p2666_p3, %p2665_p2 }
  0x2e   :  { %p2668_p5 = pnand %p2667_p4, %p2661_p1 }
  0x30   :  { %2671 = shalt.err (!%p2668_p5)
}
  0x31   :  { %91 = dma.hbm_to_vmem [thread:$0]  %s2935_s13, 16384, %s86_s24, [#allocation9], %s2707_s19, %s2707_s19, %s2708_s20  }
  0x32   :  { %2692 = dma.done.wait [#allocation3], 1024  }
  0x33   :  { %2693 = vsyncadd [#allocation3], 4294966272 }
  0x34   :  { %2694 = dma.done.wait [#allocation6], 10240  }
  0x35   :  { %2695 = vsyncadd [#allocation6], 4294957056 }
  0x36   :  { %2696 = dma.done.wait [#allocation9], 16384  }
  0x37   :  { %2697 = vsyncadd [#allocation9], 4294950912  ;;  %v2710_v0 = vmov 0.0   ;;  %vm2711_vm0 = vmmov 0   ;;  %v2266_v1 = vld [vmem:[#allocation2 + $0x38] sm:$0xff]   ;;  %v2267_v2 = vld [vmem:[#allocation2 + $0x30] sm:$0xff]  }
  0x38   :  { %2232 = vmatprep.subr.bf16.mxu0 %v2710_v0  ;;  %2248 = vmatprep.mubr.msk.bf16.mxu0 %vm2711_vm0, %v2710_v0  ;;  %v2268_v3 = vld [vmem:[#allocation2 + $0x28] sm:$0xff]   ;;  %v2269_v4 = vld [vmem:[#allocation2 + $0x20] sm:$0xff]   ;;  %v2270_v5 = vld [vmem:[#allocation2 + $0x18] sm:$0xff]   ;;  %v2712_v27 = vmov 0  }
  0x39   :  { %2233 = vmatpush3.bf16.msra.mxu0 %v2266_v1  ;;  %v2271_v6 = vld [vmem:[#allocation2 + $0x10] sm:$0xff]   ;;  %v2272_v7 = vld [vmem:[#allocation2 + $0x8] sm:$0xff]   ;;  %v2273_v8 = vld [vmem:[#allocation2] sm:$0xff]   ;;  %392 = vmatprep.mubr.bf16.mxu1 %v2712_v27 }
  0x3a   :  { %2234 = vmatprep.subr.bf16.mxu0 %v2710_v0  ;;  %v107_v9 = vld [vmem:[%s2922_s0] sm:$0xff]  ;;  %v2274_v18 = vld [vmem:[#allocation5 + $0x74] ss:$8 sps:$4 sm:$0xff]   ;;  %v2276_v19 = vld [vmem:[#allocation5 + $0x70] ss:$8 sps:$4 sm:$0xff]  }
  0x3b   :  { %v108_v10 = vpack.c.bf16 %v107_v9, %v107_v9  ;;  %v2004_v11 = vld [vmem:[%s2924_s2] ss:$0 sm:$0xff]  ;;  %360 = vmatprep.subr.bf16.mxu1 %v2274_v18  ;;  %v2277_v20 = vld [vmem:[#allocation5 + $0x64] ss:$8 sps:$4 sm:$0xff]   ;;  %v2280_v22 = vld [vmem:[#allocation5 + $0x54] ss:$8 sps:$4 sm:$0xff]  }
  0x3c   :  { %361 = vmatpush1.bf16.msra.mxu1 %v2276_v19  ;;  %v2279_v21 = vld [vmem:[#allocation5 + $0x60] ss:$8 sps:$4 sm:$0xff]   ;;  %v2282_v23 = vld [vmem:[#allocation5 + $0x50] ss:$8 sps:$4 sm:$0xff]   ;;  %v2283_v24 = vld [vmem:[#allocation5 + $0x44] ss:$8 sps:$4 sm:$0xff]   ;;  %v270_v19 = vlaneseq }
  0x3d   :  { %2235 = vmatpush3.bf16.msra.mxu0 %v2267_v2  ;;  %362 = vmatprep.subr.bf16.mxu1 %v2277_v20  ;;  %v2285_v25 = vld [vmem:[#allocation5 + $0x40] ss:$8 sps:$4 sm:$0xff]   ;;  %v2286_v26 = vld [vmem:[#allocation5 + $0x34] ss:$8 sps:$4 sm:$0xff]   ;;  %v2288_v28 = vld [vmem:[#allocation5 + $0x30] ss:$8 sps:$4 sm:$0xff]  }
  0x3e   :  { %2236 = vmatprep.subr.bf16.mxu0 %v2710_v0  ;;  %v2289_v29 = vld [vmem:[#allocation5 + $0x24] ss:$8 sps:$4 sm:$0xff]   ;;  %v2291_v30 = vld [vmem:[#allocation5 + $0x20] ss:$8 sps:$4 sm:$0xff]   ;;  %v2292_v31 = vld [vmem:[#allocation5 + $0x14] ss:$8 sps:$4 sm:$0xff]  }
  0x3f   :  { %v2294_v32 = vld [vmem:[#allocation5 + $0x10] ss:$8 sps:$4 sm:$0xff]   ;;  %v2295_v33 = vld [vmem:[#allocation5 + $0x4] ss:$8 sps:$4 sm:$0xff]   ;;  %v2297_v34 = vld [vmem:[#allocation5] ss:$8 sps:$4 sm:$0xff]  }
  0x40   :  { %363 = vmatpush1.bf16.msra.mxu1 %v2279_v21  ;;  %v2013_v44 = vld [vmem:[%s2925_s3] ss:$0 sm:$0xff]  ;;  %v2300_v52 = vld [vmem:[#allocation7 + $0xe4] ss:$16 sps:$4 sm:$0xff]   ;;  %v2301_v53 = vld [vmem:[#allocation7 + $0xe8] ss:$16 sps:$4 sm:$0xff]  }
  0x41   :  { %2237 = vmatpush3.bf16.msra.mxu0 %v2268_v3  ;;  %364 = vmatprep.subr.bf16.mxu1 %v2280_v22  ;;  %v2014_v46 = vld [vmem:[%s2926_s4] ss:$0 sm:$0xff]  ;;  %v2303_v54 = vld [vmem:[#allocation7 + $0xec] ss:$16 sps:$4 sm:$0xff]   ;;  %v2306_v55 = vld [vmem:[#allocation7 + $0xc4] ss:$16 sps:$4 sm:$0xff]  }
  0x42   :  { %2238 = vmatprep.subr.bf16.mxu0 %v2710_v0  ;;  %v2298_v51 = vld [vmem:[#allocation7 + $0xe0] ss:$16 sps:$4 sm:$0xff]   ;;  %v2309_v56 = vld [vmem:[#allocation7 + $0xcc] ss:$16 sps:$4 sm:$0xff]   ;;  %v2307_v58 = vld [vmem:[#allocation7 + $0xc8] ss:$16 sps:$4 sm:$0xff]  }
  0x43   :  { %v2304_v57 = vld [vmem:[#allocation7 + $0xc0] ss:$16 sps:$4 sm:$0xff]   ;;  %v2312_v59 = vld [vmem:[#allocation7 + $0xa4] ss:$16 sps:$4 sm:$0xff]   ;;  %v2315_v60 = vld [vmem:[#allocation7 + $0xac] ss:$16 sps:$4 sm:$0xff]  }
  0x44   :  { %365 = vmatpush1.bf16.msra.mxu1 %v2282_v23  ;;  %v2310_v61 = vld [vmem:[#allocation7 + $0xa0] ss:$16 sps:$4 sm:$0xff]   ;;  %v2313_v62 = vld [vmem:[#allocation7 + $0xa8] ss:$16 sps:$4 sm:$0xff]   ;;  %v2318_v63 = vld [vmem:[#allocation7 + $0x84] ss:$16 sps:$4 sm:$0xff]  }
  0x45   :  { %2239 = vmatpush3.bf16.msra.mxu0 %v2269_v4  ;;  %366 = vmatprep.subr.bf16.mxu1 %v2283_v24  ;;  %v2316_v1 = vld [vmem:[#allocation7 + $0x80] ss:$16 sps:$4 sm:$0xff]   ;;  %v2319_v2 = vld [vmem:[#allocation7 + $0x88] ss:$16 sps:$4 sm:$0xff]   ;;  %v2324_v3 = vld [vmem:[#allocation7 + $0x64] ss:$16 sps:$4 sm:$0xff]  }
  0x46   :  { %2240 = vmatprep.subr.bf16.mxu0 %v2710_v0  ;;  %v2327_v4 = vld [vmem:[#allocation7 + $0x6c] ss:$16 sps:$4 sm:$0xff]   ;;  %v2328_v9 = vld [vmem:[#allocation7 + $0x40] ss:$16 sps:$4 sm:$0xff]   ;;  %v2343_v18 = vld [vmem:[#allocation7 + $0x8] ss:$16 sps:$4 sm:$0xff]  }
  0x47   :  { %v2818_v20 = vshrl.u32 %v270_v19, 7  ;;  %v268_v23 = vld [vmem:[%s2928_s6] sm:$0x3] }
  0x48   :  { %367 = vmatpush1.bf16.msra.mxu1 %v2285_v25 }
  0x49   :  { %2241 = vmatpush3.bf16.msra.mxu0 %v2270_v5  ;;  %368 = vmatprep.subr.bf16.mxu1 %v2286_v26  ;;  %v2322_v5 = vld [vmem:[#allocation7 + $0x60] ss:$16 sps:$4 sm:$0xff]   ;;  %v2821_v21 = vsub.s32 0, %v2818_v20  ;;  %v2824_v22 = vsub.s32 1, %v2818_v20 }
  0x4a   :  { %2242 = vmatprep.subr.bf16.mxu0 %v2710_v0 }
  0x4b   :  { %v273_v24 = vrot.slane %v268_v23, %v2821_v21  ;;  %v277_v25 = vrot.slane %v268_v23, %v2824_v22 }
  0x4c   :  { %369 = vmatpush1.bf16.msra.mxu1 %v2288_v28 }
  0x4d   :  { %2243 = vmatpush3.bf16.msra.mxu0 %v2271_v6  ;;  %370 = vmatprep.subr.bf16.mxu1 %v2289_v29  ;;  %v2325_v6 = vld [vmem:[#allocation7 + $0x68] ss:$16 sps:$4 sm:$0xff]  }
  0x4e   :  { %2244 = vmatprep.subr.bf16.mxu0 %v2710_v0 }
  0x50   :  { %371 = vmatpush1.bf16.msra.mxu1 %v2291_v30 }
  0x51   :  { %2245 = vmatpush3.bf16.msra.mxu0 %v2272_v7  ;;  %372 = vmatprep.subr.bf16.mxu1 %v2292_v31  ;;  %v2330_v7 = vld [vmem:[#allocation7 + $0x44] ss:$16 sps:$4 sm:$0xff]  }
  0x52   :  { %2246 = vmatprep.subr.bf16.mxu0 %v2710_v0  ;;  %v2321_v0 = vld [vmem:[#allocation7 + $0x8c] ss:$16 sps:$4 sm:$0xff]  }
  0x54   :  { %373 = vmatpush1.bf16.msra.mxu1 %v2294_v32 }
  0x55   :  { %2247 = vmatpush3.bf16.msra.mxu0 %v2273_v8  ;;  %374 = vmatprep.subr.bf16.mxu1 %v2295_v33  ;;  %v2333_v8 = vld [vmem:[#allocation7 + $0x4c] ss:$16 sps:$4 sm:$0xff]  }
  0x56   :  { %858 = vmatprep.subr.bf16.mxu0 %v2300_v52  ;;  %v2372_v52 = vld [vmem:[#allocation7 + $0x164] ss:$16 sps:$4 sm:$0xff]  }
  0x58   :  { %2249 = vmatmul.mubr.bf16.vlgmr.msra.gmra.mxu0 %v108_v10  ;;  %375 = vmatpush1.bf16.msra.mxu1 %v2297_v34  ;;  %v2331_v10 = vld [vmem:[#allocation7 + $0x48] ss:$16 sps:$4 sm:$0xff]  }
  0x59   :  { %899 = vmatprep.subr.bf16.mxu1 %v2303_v54  ;;  %859 = vmatpush1.bf16.msra.mxu0 %v2298_v51  ;;  %v2367_v51 = vld [vmem:[#allocation7 + $0x188] ss:$16 sps:$4 sm:$0xff]   ;;  %v2370_v54 = vld [vmem:[#allocation7 + $0x160] ss:$16 sps:$4 sm:$0xff]  }
  0x5a   :  { %860 = vmatprep.subr.bf16.mxu0 %v2306_v55  ;;  %v2373_v55 = vld [vmem:[#allocation7 + $0x168] ss:$16 sps:$4 sm:$0xff]  }
  0x5d   :  { %861 = vmatpush1.bf16.msra.mxu0 %v2304_v57  ;;  %v2381_v57 = vld [vmem:[#allocation7 + $0x14c] ss:$16 sps:$4 sm:$0xff]  }
  0x5e   :  { %862 = vmatprep.subr.bf16.mxu0 %v2312_v59  ;;  %v2379_v59 = vld [vmem:[#allocation7 + $0x148] ss:$16 sps:$4 sm:$0xff]  }
  0x61   :  { %863 = vmatpush1.bf16.msra.mxu0 %v2310_v61  ;;  %v2387_v61 = vld [vmem:[#allocation7 + $0x12c] ss:$16 sps:$4 sm:$0xff]  }
  0x62   :  { %864 = vmatprep.subr.bf16.mxu0 %v2318_v63  ;;  %v2385_v63 = vld [vmem:[#allocation7 + $0x128] ss:$16 sps:$4 sm:$0xff]  }
  0x65   :  { %865 = vmatpush1.bf16.msra.mxu0 %v2316_v1  ;;  %v2393_v1 = vld [vmem:[#allocation7 + $0x10c] ss:$16 sps:$4 sm:$0xff]  }
  0x66   :  { %866 = vmatprep.subr.bf16.mxu0 %v2324_v3  ;;  %v2391_v3 = vld [vmem:[#allocation7 + $0x108] ss:$16 sps:$4 sm:$0xff]  }
  0x69   :  { %867 = vmatpush1.bf16.msra.mxu0 %v2322_v5 }
  0x6a   :  { %868 = vmatprep.subr.bf16.mxu0 %v2330_v7 }
  0x6d   :  { %869 = vmatpush1.bf16.msra.mxu0 %v2328_v9 }
 0x118   :  { %v214_v12 = vpop.f32.mrf.mxu0 }
 0x119   :  { %v215_v13 = vadd.f32 %v2004_v11, %v214_v12  ;;  %v2336_v11 = vld [vmem:[#allocation7 + $0x24] ss:$16 sps:$4 sm:$0xff]   ;;  %v2339_v12 = vld [vmem:[#allocation7 + $0x2c] ss:$16 sps:$4 sm:$0xff]  }
 0x11a   :  { %v2250_v14 = vpop.f32.mrf.mxu0  ;;  %870 = vmatprep.subr.bf16.mxu0 %v2336_v11  ;;  %v420_v11 = vld [vmem:[%s2929_s7] sm:$0x3] }
 0x11b   :  { %220 = vadd.xlane.f32.xlu0 %v215_v13  ;;  %v224_v16 = vmul.f32 %v215_v13, %v215_v13  ;;  %v2337_v14 = vld [vmem:[#allocation7 + $0x28] ss:$16 sps:$4 sm:$0xff]  }
 0x11c   :  { %v217_v15 = vpop.f32.mrf.mxu0 }
 0x11d   :  { %v2342_v15 = vld [vmem:[#allocation7 + $0x4] ss:$16 sps:$4 sm:$0xff]  }
 0x11e   :  { %v2251_v17 = vpop.f32.mrf.mxu0 }
 0x11f   :  { %225 = vadd.xlane.f32.xlu0 %v224_v16  ;;  %v2345_v16 = vld [vmem:[#allocation7 + $0xc] ss:$16 sps:$4 sm:$0xff]   ;;  %v2340_v17 = vld [vmem:[#allocation7] ss:$16 sps:$4 sm:$0xff]  }
 0x1a4   :  { %v221_v35 = vpop.xlane.xlu0 %220 }
 0x1a5   :  { %v223_v36 = vmul.f32 0.0078125, %v221_v35 }
 0x1a7   :  { %v228_v38 = vmul.f32 %v223_v36, %v223_v36  ;;  %v230_v42 = vsub.f32 %v215_v13, %v223_v36  ;;  %v2334_v13 = vld [vmem:[#allocation7 + $0x20] ss:$16 sps:$4 sm:$0xff]   ;;  %v2348_v36 = vld [vmem:[#allocation7 + $0x1e4] ss:$16 sps:$4 sm:$0xff]  }
 0x1a8   :  { %v226_v37 = vpop.xlane.xlu0 %225  ;;  %871 = vmatpush1.bf16.msra.mxu0 %v2334_v13 }
 0x1a9   :  { %v227_v39 = vmul.f32 0.0078125, %v226_v37  ;;  %872 = vmatprep.subr.bf16.mxu0 %v2342_v15  ;;  %v2351_v37 = vld [vmem:[#allocation7 + $0x1ec] ss:$16 sps:$4 sm:$0xff]   ;;  %v425_v15 = vrot.slane %v420_v11, %v2821_v21 }
 0x1ab   :  { %v229_v40 = vsub.f32 %v227_v39, %v228_v38  ;;  %v2346_v38 = vld [vmem:[#allocation7 + $0x1e0] ss:$16 sps:$4 sm:$0xff]   ;;  %v2349_v39 = vld [vmem:[#allocation7 + $0x1e8] ss:$16 sps:$4 sm:$0xff]  }
 0x1ac   :  { %873 = vmatpush1.bf16.msra.mxu0 %v2340_v17 }
 0x1ad   :  { %v231_v41 = vadd.f32 1e-05, %v229_v40  ;;  %874 = vmatprep.subr.bf16.mxu0 %v2348_v36  ;;  %v2354_v40 = vld [vmem:[#allocation7 + $0x1c4] ss:$16 sps:$4 sm:$0xff]  }
 0x1ae   :  { %v2399_v36 = vld [vmem:[#allocation8 + $0x2e4] ss:$16 sps:$4 sm:$0xff]  }
 0x1af   :  { %2586 = vrsqrt.f32 %v231_v41  ;;  %v2357_v41 = vld [vmem:[#allocation7 + $0x1cc] ss:$16 sps:$4 sm:$0xff]  }
 0x1b0   :  { %875 = vmatpush2.bf16.msra.mxu0 %v2346_v38  ;;  %v2405_v38 = vld [vmem:[#allocation8 + $0x2c4] ss:$16 sps:$4 sm:$0xff]  }
 0x1b1   :  { %876 = vmatprep.subr.bf16.mxu0 %v2354_v40  ;;  %v2403_v40 = vld [vmem:[#allocation8 + $0x2c0] ss:$16 sps:$4 sm:$0xff]  }
 0x1bc   :  { %v2587_v43 = vpop.eup %2586 }
 0x1bd   :  { %v233_v45 = vmul.f32 %v2587_v43, %v230_v42  ;;  %v2352_v42 = vld [vmem:[#allocation7 + $0x1c0] ss:$16 sps:$4 sm:$0xff]   ;;  %v2355_v43 = vld [vmem:[#allocation7 + $0x1c8] ss:$16 sps:$4 sm:$0xff]  }
 0x1be   :  { %877 = vmatpush2.bf16.msra.mxu0 %v2352_v42  ;;  %v2411_v42 = vld [vmem:[#allocation8 + $0x2a4] ss:$16 sps:$4 sm:$0xff]  }
 0x1bf   :  { %v241_v47 = vmul.f32 %v2013_v44, %v233_v45  ;;  %v2360_v44 = vld [vmem:[#allocation7 + $0x1a4] ss:$16 sps:$4 sm:$0xff]   ;;  %v2363_v45 = vld [vmem:[#allocation7 + $0x1ac] ss:$16 sps:$4 sm:$0xff]  }
 0x1c0   :  { %878 = vmatprep.subr.bf16.mxu0 %v2360_v44  ;;  %v2409_v44 = vld [vmem:[#allocation8 + $0x2a0] ss:$16 sps:$4 sm:$0xff]  }
 0x1c1   :  { %v249_v48 = vadd.f32 %v2014_v46, %v241_v47  ;;  %v2358_v46 = vld [vmem:[#allocation7 + $0x1a0] ss:$16 sps:$4 sm:$0xff]   ;;  %v2361_v47 = vld [vmem:[#allocation7 + $0x1a8] ss:$16 sps:$4 sm:$0xff]  }
 0x1c2   :  { %879 = vmatpush2.bf16.msra.mxu0 %v2358_v46  ;;  %v2417_v46 = vld [vmem:[#allocation8 + $0x284] ss:$16 sps:$4 sm:$0xff]  }
 0x1c3   :  { %v250_v49 = vmax.f32 %v249_v48, 0.0  ;;  %v2366_v48 = vld [vmem:[#allocation7 + $0x184] ss:$16 sps:$4 sm:$0xff]  }
 0x1c4   :  { %880 = vmatprep.subr.bf16.mxu0 %v2366_v48  ;;  %v2415_v48 = vld [vmem:[#allocation8 + $0x280] ss:$16 sps:$4 sm:$0xff]  }
 0x1c5   :  { %v251_v50 = vpack.c.bf16 %v250_v49, %v250_v49  ;;  %v2369_v49 = vld [vmem:[#allocation7 + $0x18c] ss:$16 sps:$4 sm:$0xff]  }
 0x1c7   :  { %393 = vmatmul.mubr.bf16.vlgmr.msra.gmra.mxu1 %v251_v50  ;;  %v2364_v50 = vld [vmem:[#allocation7 + $0x180] ss:$16 sps:$4 sm:$0xff]  }
 0x1c8   :  { %900 = vmatpush1.bf16.msra.mxu1 %v2301_v53  ;;  %v2375_v53 = vld [vmem:[#allocation7 + $0x16c] ss:$16 sps:$4 sm:$0xff]   ;;  %881 = vmatpush2.bf16.msra.mxu0 %v2364_v50  ;;  %v2423_v50 = vld [vmem:[#allocation8 + $0x264] ss:$16 sps:$4 sm:$0xff]  }
 0x1c9   :  { %901 = vmatprep.subr.bf16.mxu1 %v2309_v56  ;;  %882 = vmatprep.subr.bf16.mxu0 %v2372_v52  ;;  %v2378_v56 = vld [vmem:[#allocation7 + $0x144] ss:$16 sps:$4 sm:$0xff]   ;;  %v2421_v52 = vld [vmem:[#allocation8 + $0x260] ss:$16 sps:$4 sm:$0xff]  }
 0x1cc   :  { %902 = vmatpush1.bf16.msra.mxu1 %v2307_v58  ;;  %883 = vmatpush2.bf16.msra.mxu0 %v2370_v54  ;;  %v2376_v58 = vld [vmem:[#allocation7 + $0x140] ss:$16 sps:$4 sm:$0xff]   ;;  %v2429_v54 = vld [vmem:[#allocation8 + $0x244] ss:$16 sps:$4 sm:$0xff]  }
 0x1cd   :  { %903 = vmatprep.subr.bf16.mxu1 %v2315_v60  ;;  %884 = vmatprep.subr.bf16.mxu0 %v2378_v56  ;;  %v2384_v60 = vld [vmem:[#allocation7 + $0x124] ss:$16 sps:$4 sm:$0xff]   ;;  %v2427_v56 = vld [vmem:[#allocation8 + $0x240] ss:$16 sps:$4 sm:$0xff]  }
 0x1d0   :  { %904 = vmatpush1.bf16.msra.mxu1 %v2313_v62  ;;  %885 = vmatpush2.bf16.msra.mxu0 %v2376_v58  ;;  %v2382_v62 = vld [vmem:[#allocation7 + $0x120] ss:$16 sps:$4 sm:$0xff]   ;;  %v2435_v58 = vld [vmem:[#allocation8 + $0x224] ss:$16 sps:$4 sm:$0xff]  }
 0x1d1   :  { %905 = vmatprep.subr.bf16.mxu1 %v2321_v0  ;;  %886 = vmatprep.subr.bf16.mxu0 %v2384_v60  ;;  %v2390_v0 = vld [vmem:[#allocation7 + $0x104] ss:$16 sps:$4 sm:$0xff]   ;;  %v2433_v60 = vld [vmem:[#allocation8 + $0x220] ss:$16 sps:$4 sm:$0xff]  }
 0x1d4   :  { %906 = vmatpush1.bf16.msra.mxu1 %v2319_v2  ;;  %887 = vmatpush2.bf16.msra.mxu0 %v2382_v62  ;;  %v2388_v2 = vld [vmem:[#allocation7 + $0x100] ss:$16 sps:$4 sm:$0xff]   ;;  %v2441_v62 = vld [vmem:[#allocation8 + $0x204] ss:$16 sps:$4 sm:$0xff]  }
 0x1d5   :  { %907 = vmatprep.subr.bf16.mxu1 %v2327_v4  ;;  %888 = vmatprep.subr.bf16.mxu0 %v2390_v0  ;;  %v2439_v0 = vld [vmem:[#allocation8 + $0x200] ss:$16 sps:$4 sm:$0xff]  }
 0x1d8   :  { %908 = vmatpush1.bf16.msra.mxu1 %v2325_v6  ;;  %889 = vmatpush2.bf16.msra.mxu0 %v2388_v2  ;;  %v2857_v2 = vsub.s32 2, %v2818_v20 }
 0x1d9   :  { %909 = vmatprep.subr.bf16.mxu1 %v2333_v8 }
 0x1dc   :  { %910 = vmatpush1.bf16.msra.mxu1 %v2331_v10 }
 0x1dd   :  { %911 = vmatprep.subr.bf16.mxu1 %v2339_v12  ;;  %v434_v12 = vld [vmem:[%s2930_s8] sm:$0x3] }
 0x1de   :  { %v439_v19 = vrot.slane %v434_v12, %v2821_v21  ;;  %v443_v23 = vrot.slane %v434_v12, %v2824_v22 }
 0x1e0   :  { %912 = vmatpush1.bf16.msra.mxu1 %v2337_v14 }
 0x1e1   :  { %913 = vmatprep.subr.bf16.mxu1 %v2345_v16  ;;  %v429_v16 = vrot.slane %v420_v11, %v2824_v22 }
 0x1e4   :  { %914 = vmatpush1.bf16.msra.mxu1 %v2343_v18 }
 0x1e5   :  { %915 = vmatprep.subr.bf16.mxu1 %v2351_v37  ;;  %v2402_v37 = vld [vmem:[#allocation8 + $0xc4] ss:$16 sps:$4 sm:$0xff]  }
 0x1e8   :  { %916 = vmatpush2.bf16.msra.mxu1 %v2349_v39  ;;  %v2400_v39 = vld [vmem:[#allocation8 + $0xc0] ss:$16 sps:$4 sm:$0xff]  }
 0x1e9   :  { %917 = vmatprep.subr.bf16.mxu1 %v2357_v41  ;;  %v2408_v41 = vld [vmem:[#allocation8 + $0xa4] ss:$16 sps:$4 sm:$0xff]  }
 0x1ec   :  { %918 = vmatpush2.bf16.msra.mxu1 %v2355_v43  ;;  %v2406_v43 = vld [vmem:[#allocation8 + $0xa0] ss:$16 sps:$4 sm:$0xff]  }
 0x1ed   :  { %919 = vmatprep.subr.bf16.mxu1 %v2363_v45  ;;  %v2414_v45 = vld [vmem:[#allocation8 + $0x84] ss:$16 sps:$4 sm:$0xff]  }
 0x1f0   :  { %920 = vmatpush2.bf16.msra.mxu1 %v2361_v47  ;;  %v2412_v47 = vld [vmem:[#allocation8 + $0x80] ss:$16 sps:$4 sm:$0xff]  }
 0x1f1   :  { %921 = vmatprep.subr.bf16.mxu1 %v2369_v49  ;;  %v2420_v49 = vld [vmem:[#allocation8 + $0x64] ss:$16 sps:$4 sm:$0xff]  }
 0x1f4   :  { %922 = vmatpush2.bf16.msra.mxu1 %v2367_v51  ;;  %v2418_v51 = vld [vmem:[#allocation8 + $0x60] ss:$16 sps:$4 sm:$0xff]  }
 0x1f5   :  { %923 = vmatprep.subr.bf16.mxu1 %v2375_v53  ;;  %v2426_v53 = vld [vmem:[#allocation8 + $0x44] ss:$16 sps:$4 sm:$0xff]  }
 0x1f8   :  { %924 = vmatpush2.bf16.msra.mxu1 %v2373_v55  ;;  %v2424_v55 = vld [vmem:[#allocation8 + $0x40] ss:$16 sps:$4 sm:$0xff]  }
 0x1f9   :  { %925 = vmatprep.subr.bf16.mxu1 %v2381_v57  ;;  %v2432_v57 = vld [vmem:[#allocation8 + $0x24] ss:$16 sps:$4 sm:$0xff]  }
 0x1fc   :  { %926 = vmatpush2.bf16.msra.mxu1 %v2379_v59  ;;  %v2430_v59 = vld [vmem:[#allocation8 + $0x20] ss:$16 sps:$4 sm:$0xff]  }
 0x1fd   :  { %927 = vmatprep.subr.bf16.mxu1 %v2387_v61  ;;  %v2438_v61 = vld [vmem:[#allocation8 + $0x4] ss:$16 sps:$4 sm:$0xff]  }
 0x200   :  { %928 = vmatpush2.bf16.msra.mxu1 %v2385_v63  ;;  %v2436_v63 = vld [vmem:[#allocation8] ss:$16 sps:$4 sm:$0xff]  }
 0x201   :  { %929 = vmatprep.subr.bf16.mxu1 %v2393_v1  ;;  %v516_v1 = vld [vmem:[%s2932_s10] sm:$0xf] }
 0x204   :  { %930 = vmatpush2.bf16.msra.mxu1 %v2391_v3  ;;  %v521_v3 = vrot.slane %v516_v1, %v2821_v21 }
 0x205   :  { %1860 = vmatprep.subr.bf16.mxu1 %v2399_v36  ;;  %v2450_v36 = vld [vmem:[#allocation8 + $0x1c4] ss:$16 sps:$4 sm:$0xff]  }
 0x287   :  { %v394_v26 = vpop.f32.mrf.mxu1 }
 0x288   :  { %v2831_v28 = vadd.f32 %v394_v26, %v273_v24 }
 0x289   :  { %v396_v27 = vpop.f32.mrf.mxu1 }
 0x28a   :  { %v2833_v29 = vadd.f32 %v396_v27, %v277_v25  ;;  %v406_v34 = vmul.f32 %v2831_v28, %v2831_v28 }
 0x28b   :  { %v398_v30 = vpop.f32.mrf.mxu1 }
 0x28c   :  { %v401_v31 = vadd.f32 %v2833_v29, %v2831_v28  ;;  %v407_v32 = vmul.f32 %v2833_v29, %v2833_v29 }
 0x28d   :  { %v399_v33 = vpop.f32.mrf.mxu1 }
 0x28e   :  { %402 = vadd.xlane.f32.xlu1 %v401_v31  ;;  %v408_v35 = vadd.f32 %v407_v32, %v406_v34  ;;  %v2396_v34 = vld [vmem:[#allocation8 + $0xe4] ss:$16 sps:$4 sm:$0xff]  }
 0x28f   :  { %1819 = vmatprep.subr.bf16.mxu0 %v2396_v34  ;;  %v2442_v34 = vld [vmem:[#allocation8 + $0x1e0] ss:$16 sps:$4 sm:$0xff]  }
 0x292   :  { %409 = vadd.xlane.f32.xlu1 %v408_v35  ;;  %v2397_v35 = vld [vmem:[#allocation8 + $0x2e0] ss:$16 sps:$4 sm:$0xff]  }
 0x317   :  { %v403_v4 = vpop.xlane.xlu1 %402 }
 0x318   :  { %v405_v5 = vmul.f32 0.00390625, %v403_v4  ;;  %v2861_v4 = vsub.s32 3, %v2818_v20 }
 0x31a   :  { %v412_v7 = vmul.f32 %v405_v5, %v405_v5  ;;  %v414_v13 = vsub.f32 %v2831_v28, %v405_v5  ;;  %v415_v14 = vsub.f32 %v2833_v29, %v405_v5  ;;  %v2394_v29 = vld [vmem:[#allocation8 + $0xe0] ss:$16 sps:$4 sm:$0xff]   ;;  %v529_v5 = vrot.slane %v516_v1, %v2857_v2 }
 0x31b   :  { %v410_v6 = vpop.xlane.xlu1 %409 }
 0x31c   :  { %v411_v8 = vmul.f32 0.00390625, %v410_v6  ;;  %v525_v6 = vrot.slane %v516_v1, %v2824_v22 }
 0x31e   :  { %v413_v9 = vsub.f32 %v411_v8, %v412_v7 }
 0x320   :  { %v416_v10 = vadd.f32 1e-05, %v413_v9 }
 0x322   :  { %2588 = vrsqrt.f32 %v416_v10  ;;  %v533_v10 = vrot.slane %v516_v1, %v2861_v4  ;;  %v2495_v1 = vld [vmem:[#allocation8 + $0x2ec] ss:$16 sps:$4 sm:$0xff]  }
 0x32f   :  { %v2589_v17 = vpop.eup %2588 }
 0x330   :  { %v419_v18 = vmul.f32 %v2589_v17, %v415_v14  ;;  %v418_v24 = vmul.f32 %v2589_v17, %v414_v13 }
 0x332   :  { %v433_v25 = vmul.f32 %v429_v16, %v419_v18  ;;  %v432_v26 = vmul.f32 %v425_v15, %v418_v24 }
 0x334   :  { %v447_v27 = vadd.f32 %v443_v23, %v433_v25  ;;  %v446_v30 = vadd.f32 %v439_v19, %v432_v26 }
 0x336   :  { %v449_v31 = vmax.f32 %v447_v27, 0.0  ;;  %v448_v32 = vmax.f32 %v446_v30, 0.0 }
 0x338   :  { %v451_v28 = vpack.c.bf16 %v449_v31, %v449_v31  ;;  %v450_v33 = vpack.c.bf16 %v448_v32, %v448_v32 }
 0x33a   :  { %890 = vmatprep.mubr.bf16.mxu0 %v451_v28  ;;  %931 = vmatprep.mubr.bf16.mxu1 %v451_v28 }
 0x33b   :  { %891 = vmatmul.mubr.bf16.vlgmr.msra.gmra.mxu0 %v450_v33  ;;  %932 = vmatmul.mubr.bf16.vlgmr.msra.gmra.mxu1 %v450_v33  ;;  %v2444_v33 = vld [vmem:[#allocation8 + $0x1e4] ss:$16 sps:$4 sm:$0xff]  }
 0x33c   :  { %1820 = vmatpush1.bf16.msra.mxu0 %v2394_v29  ;;  %1861 = vmatpush1.bf16.msra.mxu1 %v2397_v35  ;;  %v2447_v29 = vld [vmem:[#allocation8 + $0x3e4] ss:$16 sps:$4 sm:$0xff]   ;;  %v2445_v35 = vld [vmem:[#allocation8 + $0x3e0] ss:$16 sps:$4 sm:$0xff]  }
 0x33d   :  { %1821 = vmatprep.subr.bf16.mxu0 %v2402_v37  ;;  %1862 = vmatprep.subr.bf16.mxu1 %v2405_v38  ;;  %v2453_v37 = vld [vmem:[#allocation8 + $0x3c4] ss:$16 sps:$4 sm:$0xff]   ;;  %v2448_v38 = vld [vmem:[#allocation8 + $0x1c0] ss:$16 sps:$4 sm:$0xff]  }
 0x340   :  { %1822 = vmatpush1.bf16.msra.mxu0 %v2400_v39  ;;  %1863 = vmatpush1.bf16.msra.mxu1 %v2403_v40  ;;  %v2451_v39 = vld [vmem:[#allocation8 + $0x3c0] ss:$16 sps:$4 sm:$0xff]   ;;  %v2456_v40 = vld [vmem:[#allocation8 + $0x1a4] ss:$16 sps:$4 sm:$0xff]  }
 0x341   :  { %1823 = vmatprep.subr.bf16.mxu0 %v2408_v41  ;;  %1864 = vmatprep.subr.bf16.mxu1 %v2411_v42  ;;  %v2459_v41 = vld [vmem:[#allocation8 + $0x3a4] ss:$16 sps:$4 sm:$0xff]   ;;  %v2454_v42 = vld [vmem:[#allocation8 + $0x1a0] ss:$16 sps:$4 sm:$0xff]  }
 0x344   :  { %1824 = vmatpush1.bf16.msra.mxu0 %v2406_v43  ;;  %1865 = vmatpush1.bf16.msra.mxu1 %v2409_v44  ;;  %v2457_v43 = vld [vmem:[#allocation8 + $0x3a0] ss:$16 sps:$4 sm:$0xff]   ;;  %v2462_v44 = vld [vmem:[#allocation8 + $0x184] ss:$16 sps:$4 sm:$0xff]  }
 0x345   :  { %1825 = vmatprep.subr.bf16.mxu0 %v2414_v45  ;;  %1866 = vmatprep.subr.bf16.mxu1 %v2417_v46  ;;  %v2460_v45 = vld [vmem:[#allocation8 + $0x180] ss:$16 sps:$4 sm:$0xff]  }
 0x346   :  { %v2463_v46 = vld [vmem:[#allocation8 + $0x380] ss:$16 sps:$4 sm:$0xff]  }
 0x348   :  { %1826 = vmatpush1.bf16.msra.mxu0 %v2412_v47  ;;  %1867 = vmatpush1.bf16.msra.mxu1 %v2415_v48  ;;  %v2465_v47 = vld [vmem:[#allocation8 + $0x384] ss:$16 sps:$4 sm:$0xff]  }
 0x349   :  { %1827 = vmatprep.subr.bf16.mxu0 %v2420_v49  ;;  %1868 = vmatprep.subr.bf16.mxu1 %v2423_v50  ;;  %v2468_v48 = vld [vmem:[#allocation8 + $0x164] ss:$16 sps:$4 sm:$0xff]   ;;  %v2466_v50 = vld [vmem:[#allocation8 + $0x160] ss:$16 sps:$4 sm:$0xff]  }
 0x34a   :  { %v2471_v49 = vld [vmem:[#allocation8 + $0x364] ss:$16 sps:$4 sm:$0xff]  }
 0x34c   :  { %1828 = vmatpush1.bf16.msra.mxu0 %v2418_v51  ;;  %1869 = vmatpush1.bf16.msra.mxu1 %v2421_v52  ;;  %v2469_v51 = vld [vmem:[#allocation8 + $0x360] ss:$16 sps:$4 sm:$0xff]   ;;  %v2474_v52 = vld [vmem:[#allocation8 + $0x144] ss:$16 sps:$4 sm:$0xff]  }
 0x34d   :  { %1829 = vmatprep.subr.bf16.mxu0 %v2426_v53  ;;  %1870 = vmatprep.subr.bf16.mxu1 %v2429_v54  ;;  %v2477_v53 = vld [vmem:[#allocation8 + $0x344] ss:$16 sps:$4 sm:$0xff]   ;;  %v2472_v54 = vld [vmem:[#allocation8 + $0x140] ss:$16 sps:$4 sm:$0xff]  }
 0x350   :  { %1830 = vmatpush1.bf16.msra.mxu0 %v2424_v55  ;;  %1871 = vmatpush1.bf16.msra.mxu1 %v2427_v56  ;;  %v2475_v55 = vld [vmem:[#allocation8 + $0x340] ss:$16 sps:$4 sm:$0xff]   ;;  %v2480_v56 = vld [vmem:[#allocation8 + $0x124] ss:$16 sps:$4 sm:$0xff]  }
 0x351   :  { %1831 = vmatprep.subr.bf16.mxu0 %v2432_v57  ;;  %1872 = vmatprep.subr.bf16.mxu1 %v2435_v58  ;;  %v2483_v57 = vld [vmem:[#allocation8 + $0x324] ss:$16 sps:$4 sm:$0xff]   ;;  %v2478_v58 = vld [vmem:[#allocation8 + $0x120] ss:$16 sps:$4 sm:$0xff]  }
 0x354   :  { %1832 = vmatpush1.bf16.msra.mxu0 %v2430_v59  ;;  %1873 = vmatpush1.bf16.msra.mxu1 %v2433_v60  ;;  %v2481_v59 = vld [vmem:[#allocation8 + $0x320] ss:$16 sps:$4 sm:$0xff]   ;;  %v2486_v60 = vld [vmem:[#allocation8 + $0x104] ss:$16 sps:$4 sm:$0xff]  }
 0x355   :  { %1833 = vmatprep.subr.bf16.mxu0 %v2438_v61  ;;  %1874 = vmatprep.subr.bf16.mxu1 %v2441_v62  ;;  %v2489_v61 = vld [vmem:[#allocation8 + $0x304] ss:$16 sps:$4 sm:$0xff]   ;;  %v2484_v62 = vld [vmem:[#allocation8 + $0x100] ss:$16 sps:$4 sm:$0xff]  }
 0x358   :  { %1834 = vmatpush1.bf16.msra.mxu0 %v2436_v63  ;;  %1875 = vmatpush1.bf16.msra.mxu1 %v2439_v0  ;;  %v2487_v63 = vld [vmem:[#allocation8 + $0x300] ss:$16 sps:$4 sm:$0xff]   ;;  %v2492_v0 = vld [vmem:[#allocation8 + $0xec] ss:$16 sps:$4 sm:$0xff]  }
 0x359   :  { %1835 = vmatprep.subr.bf16.mxu0 %v2444_v33  ;;  %1876 = vmatprep.subr.bf16.mxu1 %v2447_v29 }
 0x35c   :  { %1836 = vmatpush2.bf16.msra.mxu0 %v2442_v34  ;;  %1877 = vmatpush2.bf16.msra.mxu1 %v2445_v35 }
 0x35d   :  { %1837 = vmatprep.subr.bf16.mxu0 %v2450_v36  ;;  %1878 = vmatprep.subr.bf16.mxu1 %v2453_v37 }
 0x360   :  { %1838 = vmatpush2.bf16.msra.mxu0 %v2448_v38  ;;  %1879 = vmatpush2.bf16.msra.mxu1 %v2451_v39 }
 0x361   :  { %1839 = vmatprep.subr.bf16.mxu0 %v2456_v40  ;;  %1880 = vmatprep.subr.bf16.mxu1 %v2459_v41 }
 0x364   :  { %1840 = vmatpush2.bf16.msra.mxu0 %v2454_v42  ;;  %1881 = vmatpush2.bf16.msra.mxu1 %v2457_v43 }
 0x365   :  { %1841 = vmatprep.subr.bf16.mxu0 %v2462_v44  ;;  %1882 = vmatprep.subr.bf16.mxu1 %v2465_v47  ;;  %v2493_v47 = vld [vmem:[#allocation8 + $0x2e8] ss:$16 sps:$4 sm:$0xff]  }
 0x368   :  { %1842 = vmatpush2.bf16.msra.mxu0 %v2460_v45  ;;  %1883 = vmatpush2.bf16.msra.mxu1 %v2463_v46  ;;  %v2490_v46 = vld [vmem:[#allocation8 + $0xe8] ss:$16 sps:$4 sm:$0xff]  }
 0x369   :  { %1843 = vmatprep.subr.bf16.mxu0 %v2468_v48  ;;  %1884 = vmatprep.subr.bf16.mxu1 %v2471_v49 }
 0x36c   :  { %1844 = vmatpush2.bf16.msra.mxu0 %v2466_v50  ;;  %1885 = vmatpush2.bf16.msra.mxu1 %v2469_v51  ;;  %v2498_v50 = vld [vmem:[#allocation8 + $0xcc] ss:$16 sps:$4 sm:$0xff]  }
 0x36d   :  { %1845 = vmatprep.subr.bf16.mxu0 %v2474_v52  ;;  %1886 = vmatprep.subr.bf16.mxu1 %v2477_v53  ;;  %v2501_v51 = vld [vmem:[#allocation8 + $0x2cc] ss:$16 sps:$4 sm:$0xff]   ;;  %v2496_v52 = vld [vmem:[#allocation8 + $0xc8] ss:$16 sps:$4 sm:$0xff]  }
 0x36e   :  { %v2499_v53 = vld [vmem:[#allocation8 + $0x2c8] ss:$16 sps:$4 sm:$0xff]  }
 0x370   :  { %1846 = vmatpush2.bf16.msra.mxu0 %v2472_v54  ;;  %1887 = vmatpush2.bf16.msra.mxu1 %v2475_v55  ;;  %v2504_v54 = vld [vmem:[#allocation8 + $0xac] ss:$16 sps:$4 sm:$0xff]  }
 0x371   :  { %1847 = vmatprep.subr.bf16.mxu0 %v2480_v56  ;;  %1888 = vmatprep.subr.bf16.mxu1 %v2483_v57  ;;  %v2507_v55 = vld [vmem:[#allocation8 + $0x2ac] ss:$16 sps:$4 sm:$0xff]   ;;  %v2502_v56 = vld [vmem:[#allocation8 + $0xa8] ss:$16 sps:$4 sm:$0xff]  }
 0x372   :  { %v2505_v57 = vld [vmem:[#allocation8 + $0x2a8] ss:$16 sps:$4 sm:$0xff]  }
 0x374   :  { %1848 = vmatpush2.bf16.msra.mxu0 %v2478_v58  ;;  %1889 = vmatpush2.bf16.msra.mxu1 %v2481_v59  ;;  %v2510_v58 = vld [vmem:[#allocation8 + $0x8c] ss:$16 sps:$4 sm:$0xff]  }
 0x375   :  { %1849 = vmatprep.subr.bf16.mxu0 %v2486_v60  ;;  %1890 = vmatprep.subr.bf16.mxu1 %v2489_v61  ;;  %v2513_v59 = vld [vmem:[#allocation8 + $0x28c] ss:$16 sps:$4 sm:$0xff]   ;;  %v2508_v60 = vld [vmem:[#allocation8 + $0x88] ss:$16 sps:$4 sm:$0xff]  }
 0x376   :  { %v2511_v61 = vld [vmem:[#allocation8 + $0x288] ss:$16 sps:$4 sm:$0xff]  }
 0x378   :  { %1850 = vmatpush2.bf16.msra.mxu0 %v2484_v62  ;;  %1891 = vmatpush2.bf16.msra.mxu1 %v2487_v63  ;;  %v2516_v62 = vld [vmem:[#allocation8 + $0x6c] ss:$16 sps:$4 sm:$0xff]  }
 0x379   :  { %1901 = vmatprep.subr.bf16.mxu0 %v2492_v0  ;;  %1942 = vmatprep.subr.bf16.mxu1 %v2495_v1  ;;  %v2519_v63 = vld [vmem:[#allocation8 + $0x26c] ss:$16 sps:$4 sm:$0xff]   ;;  %v2514_v0 = vld [vmem:[#allocation8 + $0x68] ss:$16 sps:$4 sm:$0xff]  }
 0x37a   :  { %v2517_v1 = vld [vmem:[#allocation8 + $0x268] ss:$16 sps:$4 sm:$0xff]  }
 0x3fb   :  { %v892_v7 = vpop.f32.mrf.mxu0  ;;  %v933_v8 = vpop.f32.mrf.mxu1 }
 0x3fc   :  { %v2865_v9 = vadd.f32 %v892_v7, %v521_v3  ;;  %v2868_v13 = vadd.f32 %v933_v8, %v529_v5 }
 0x3fd   :  { %v894_v11 = vpop.f32.mrf.mxu0  ;;  %v935_v12 = vpop.f32.mrf.mxu1 }
 0x3fe   :  { %v2870_v14 = vadd.f32 %v894_v11, %v525_v6  ;;  %v947_v20 = vmul.f32 %v2865_v9, %v2865_v9  ;;  %v2878_v19 = vadd.f32 %v935_v12, %v533_v10  ;;  %v949_v25 = vmul.f32 %v2868_v13, %v2868_v13  ;;  %v969_v12 = vld [vmem:[%s2933_s11] sm:$0xf] }
 0x3ff   :  { %v896_v15 = vpop.f32.mrf.mxu0  ;;  %v937_v16 = vpop.f32.mrf.mxu1 }
 0x400   :  { %v940_v17 = vadd.f32 %v2870_v14, %v2865_v9  ;;  %v948_v18 = vmul.f32 %v2870_v14, %v2870_v14  ;;  %v950_v31 = vmul.f32 %v2878_v19, %v2878_v19  ;;  %v995_v15 = vld [vmem:[%s2934_s12] sm:$0xf]  ;;  %v978_v16 = vrot.slane %v969_v12, %v2824_v22 }
 0x401   :  { %v897_v23 = vpop.f32.mrf.mxu0  ;;  %v938_v24 = vpop.f32.mrf.mxu1 }
 0x402   :  { %v941_v26 = vadd.f32 %v940_v17, %v2868_v13  ;;  %v951_v27 = vadd.f32 %v948_v18, %v947_v20  ;;  %v986_v20 = vrot.slane %v969_v12, %v2861_v4  ;;  %v974_v17 = vrot.slane %v969_v12, %v2821_v21 }
 0x403   :  { %v982_v18 = vrot.slane %v969_v12, %v2857_v2  ;;  %v2529_v12 = vld [vmem:[#allocation8 + $0x228] ss:$16 sps:$4 sm:$0xff]  }
 0x404   :  { %v942_v30 = vadd.f32 %v941_v26, %v2878_v19  ;;  %v952_v32 = vadd.f32 %v951_v27, %v949_v25 }
 0x406   :  { %943 = vadd.xlane.f32.xlu0 %v942_v30  ;;  %v953_v28 = vadd.f32 %v952_v32, %v950_v31  ;;  %v1004_v30 = vrot.slane %v995_v15, %v2824_v22  ;;  %v1012_v31 = vrot.slane %v995_v15, %v2861_v4  ;;  %v1000_v32 = vrot.slane %v995_v15, %v2821_v21 }
 0x408   :  { %954 = vadd.xlane.f32.xlu1 %v953_v28  ;;  %v1008_v28 = vrot.slane %v995_v15, %v2857_v2  ;;  %v2534_v15 = vld [vmem:[#allocation8 + $0xc] ss:$16 sps:$4 sm:$0xff]  }
 0x48f   :  { %v944_v3 = vpop.xlane.xlu0 %943 }
 0x490   :  { %v946_v5 = vmul.f32 0.001953125, %v944_v3  ;;  %v2522_v3 = vld [vmem:[#allocation8 + $0x4c] ss:$16 sps:$4 sm:$0xff]  }
 0x491   :  { %v955_v6 = vpop.xlane.xlu1 %954 }
 0x492   :  { %v956_v7 = vmul.f32 0.001953125, %v955_v6  ;;  %v957_v8 = vmul.f32 %v946_v5, %v946_v5  ;;  %v959_v23 = vsub.f32 %v2865_v9, %v946_v5  ;;  %v961_v24 = vsub.f32 %v2868_v13, %v946_v5  ;;  %v2520_v6 = vld [vmem:[#allocation8 + $0x48] ss:$16 sps:$4 sm:$0xff]  }
 0x493   :  { %v960_v25 = vsub.f32 %v2870_v14, %v946_v5  ;;  %v962_v26 = vsub.f32 %v2878_v19, %v946_v5  ;;  %v2525_v5 = vld [vmem:[#allocation8 + $0x24c] ss:$16 sps:$4 sm:$0xff]  }
 0x494   :  { %v958_v10 = vsub.f32 %v956_v7, %v957_v8  ;;  %v2523_v7 = vld [vmem:[#allocation8 + $0x248] ss:$16 sps:$4 sm:$0xff]   ;;  %v2528_v8 = vld [vmem:[#allocation8 + $0x2c] ss:$16 sps:$4 sm:$0xff]  }
 0x496   :  { %v963_v11 = vadd.f32 1e-05, %v958_v10  ;;  %v2531_v10 = vld [vmem:[#allocation8 + $0x22c] ss:$16 sps:$4 sm:$0xff]  }
 0x498   :  { %2590 = vrsqrt.f32 %v963_v11  ;;  %v2526_v11 = vld [vmem:[#allocation8 + $0x28] ss:$16 sps:$4 sm:$0xff]  }
 0x4a5   :  { %v2591_v27 = vpop.eup %2590 }
 0x4a6   :  { %v966_v33 = vmul.f32 %v2591_v27, %v960_v25  ;;  %v968_v29 = vmul.f32 %v2591_v27, %v962_v26  ;;  %v965_v34 = vmul.f32 %v2591_v27, %v959_v23  ;;  %v967_v35 = vmul.f32 %v2591_v27, %v961_v24  ;;  %v2543_v23 = vld [vmem:[#allocation8 + $0x3ec] ss:$16 sps:$4 sm:$0xff]   ;;  %v2538_v24 = vld [vmem:[#allocation8 + $0x1e8] ss:$16 sps:$4 sm:$0xff]  }
 0x4a7   :  { %v2541_v25 = vld [vmem:[#allocation8 + $0x3e8] ss:$16 sps:$4 sm:$0xff]   ;;  %v2546_v26 = vld [vmem:[#allocation8 + $0x1cc] ss:$16 sps:$4 sm:$0xff]  }
 0x4a8   :  { %v992_v9 = vmul.f32 %v978_v16, %v966_v33  ;;  %v994_v36 = vmul.f32 %v986_v20, %v968_v29  ;;  %v991_v13 = vmul.f32 %v974_v17, %v965_v34  ;;  %v993_v37 = vmul.f32 %v982_v18, %v967_v35  ;;  %v2537_v16 = vld [vmem:[#allocation8 + $0x20c] ss:$16 sps:$4 sm:$0xff]   ;;  %v2532_v20 = vld [vmem:[#allocation8 + $0x8] ss:$16 sps:$4 sm:$0xff]  }
 0x4a9   :  { %v2535_v17 = vld [vmem:[#allocation8 + $0x208] ss:$16 sps:$4 sm:$0xff]   ;;  %v2540_v18 = vld [vmem:[#allocation8 + $0x1ec] ss:$16 sps:$4 sm:$0xff]  }
 0x4aa   :  { %v1018_v14 = vadd.f32 %v1004_v30, %v992_v9  ;;  %v1020_v38 = vadd.f32 %v1012_v31, %v994_v36  ;;  %v1017_v19 = vadd.f32 %v1000_v32, %v991_v13  ;;  %v1019_v39 = vadd.f32 %v1008_v28, %v993_v37  ;;  %v2549_v27 = vld [vmem:[#allocation8 + $0x3cc] ss:$16 sps:$4 sm:$0xff]   ;;  %v2544_v30 = vld [vmem:[#allocation8 + $0x1c8] ss:$16 sps:$4 sm:$0xff]  }
 0x4ab   :  { %v2547_v31 = vld [vmem:[#allocation8 + $0x3c8] ss:$16 sps:$4 sm:$0xff]   ;;  %v2552_v32 = vld [vmem:[#allocation8 + $0x1ac] ss:$16 sps:$4 sm:$0xff]  }
 0x4ac   :  { %v1022_v40 = vmax.f32 %v1018_v14, 0.0  ;;  %v1024_v41 = vmax.f32 %v1020_v38, 0.0  ;;  %v1021_v42 = vmax.f32 %v1017_v19, 0.0  ;;  %v1023_v43 = vmax.f32 %v1019_v39, 0.0  ;;  %v2555_v28 = vld [vmem:[#allocation8 + $0x3ac] ss:$16 sps:$4 sm:$0xff]  }
 0x4ad   :  { %v2550_v33 = vld [vmem:[#allocation8 + $0x1a8] ss:$16 sps:$4 sm:$0xff]   ;;  %v2558_v34 = vld [vmem:[#allocation8 + $0x18c] ss:$16 sps:$4 sm:$0xff]  }
 0x4ae   :  { %v1026_v44 = vpack.c.bf16 %v1022_v40, %v1022_v40  ;;  %v1028_v45 = vpack.c.bf16 %v1024_v41, %v1024_v41  ;;  %v2904_v48 = vpack.c.bf16 %v1021_v42, %v1021_v42  ;;  %v2906_v49 = vpack.c.bf16 %v1023_v43, %v1023_v43  ;;  %v2553_v29 = vld [vmem:[#allocation8 + $0x3a8] ss:$16 sps:$4 sm:$0xff]   ;;  %v2561_v35 = vld [vmem:[#allocation8 + $0x38c] ss:$16 sps:$4 sm:$0xff]  }
 0x4af   :  { %v2556_v9 = vld [vmem:[#allocation8 + $0x188] ss:$16 sps:$4 sm:$0xff]   ;;  %v2564_v13 = vld [vmem:[#allocation8 + $0x16c] ss:$16 sps:$4 sm:$0xff]  }
 0x4b0   :  { %1851 = vmatprep.mubr.bf16.mxu0 %v1026_v44  ;;  %1892 = vmatprep.mubr.bf16.mxu1 %v1028_v45  ;;  %v2559_v36 = vld [vmem:[#allocation8 + $0x388] ss:$16 sps:$4 sm:$0xff]   ;;  %v2567_v37 = vld [vmem:[#allocation8 + $0x36c] ss:$16 sps:$4 sm:$0xff]  }
 0x4b1   :  { %1852 = vmatmul.mubr.bf16.vlgmr.msra.gmra.mxu0 %v2904_v48  ;;  %1893 = vmatmul.mubr.bf16.vlgmr.msra.gmra.mxu1 %v2906_v49  ;;  %v2562_v14 = vld [vmem:[#allocation8 + $0x168] ss:$16 sps:$4 sm:$0xff]   ;;  %v2570_v19 = vld [vmem:[#allocation8 + $0x14c] ss:$16 sps:$4 sm:$0xff]  }
 0x4b2   :  { %1902 = vmatpush1.bf16.msra.mxu0 %v2490_v46  ;;  %1943 = vmatpush1.bf16.msra.mxu1 %v2493_v47  ;;  %v2565_v38 = vld [vmem:[#allocation8 + $0x368] ss:$16 sps:$4 sm:$0xff]   ;;  %v2573_v39 = vld [vmem:[#allocation8 + $0x34c] ss:$16 sps:$4 sm:$0xff]  }
 0x4b3   :  { %1933 = vmatprep.mubr.bf16.mxu0 %v1026_v44  ;;  %1974 = vmatprep.mubr.bf16.mxu1 %v1028_v45  ;;  %v2568_v40 = vld [vmem:[#allocation8 + $0x148] ss:$16 sps:$4 sm:$0xff]   ;;  %v2576_v42 = vld [vmem:[#allocation8 + $0x12c] ss:$16 sps:$4 sm:$0xff]  }
 0x4b4   :  { %1903 = vmatprep.subr.bf16.mxu0 %v2498_v50  ;;  %1944 = vmatprep.subr.bf16.mxu1 %v2501_v51  ;;  %v2571_v41 = vld [vmem:[#allocation8 + $0x348] ss:$16 sps:$4 sm:$0xff]   ;;  %v2579_v43 = vld [vmem:[#allocation8 + $0x32c] ss:$16 sps:$4 sm:$0xff]  }
 0x4b5   :  { %v2574_v44 = vld [vmem:[#allocation8 + $0x128] ss:$16 sps:$4 sm:$0xff]   ;;  %v2582_v46 = vld [vmem:[#allocation8 + $0x10c] ss:$16 sps:$4 sm:$0xff]  }
 0x4b6   :  { %1904 = vmatpush1.bf16.msra.mxu0 %v2496_v52  ;;  %1945 = vmatpush1.bf16.msra.mxu1 %v2499_v53  ;;  %v2577_v45 = vld [vmem:[#allocation8 + $0x328] ss:$16 sps:$4 sm:$0xff]   ;;  %v2585_v47 = vld [vmem:[#allocation8 + $0x30c] ss:$16 sps:$4 sm:$0xff]   ;;  %v1157_v52 = vld [vmem:[%s2936_s14] sm:$0xf] }
 0x4b7   :  { %1905 = vmatprep.subr.bf16.mxu0 %v2504_v54  ;;  %1946 = vmatprep.subr.bf16.mxu1 %v2507_v55  ;;  %v2580_v50 = vld [vmem:[#allocation8 + $0x108] ss:$16 sps:$4 sm:$0xff]   ;;  %v1162_v53 = vrot.slane %v1157_v52, %v2821_v21  ;;  %v1166_v54 = vrot.slane %v1157_v52, %v2824_v22  ;;  %v1174_v21 = vrot.slane %v1157_v52, %v2861_v4  ;;  %s2713_s14 = smov [#allocation10]  }
 0x4b8   :  { %v2583_v51 = vld [vmem:[#allocation8 + $0x308] ss:$16 sps:$4 sm:$0xff]   ;;  %s1993_s21 = sshll.u32 %s2713_s14, 4  ;;  %s1994_s21 = int_to_ptr.vmem [resolvable:$true] %s1993_s21 }
 0x4b9   :  { %s2672_s22 = scalar_lea.vmem %s1994_s21, 512  ;;  %p2677_p7 = scmp.lt.s32.totalorder %s1994_s21, %s1994_s21 }
 0x4ba   :  { %1906 = vmatpush1.bf16.msra.mxu0 %v2502_v56  ;;  %1947 = vmatpush1.bf16.msra.mxu1 %v2505_v57  ;;  %p2673_p6 = scmp.ne.s32.totalorder %s1994_s21, %s2672_s22  ;;  %p2678_p8 = scmp.lt.s32.totalorder %s2672_s22, %s2672_s22 }
 0x4bb   :  { %1907 = vmatprep.subr.bf16.mxu0 %v2510_v58  ;;  %1948 = vmatprep.subr.bf16.mxu1 %v2513_v59 }
 0x4bc   :  { %p2679_p9 = por %p2678_p8, %p2677_p7 }
 0x4be   :  { %1908 = vmatpush1.bf16.msra.mxu0 %v2508_v60  ;;  %1949 = vmatpush1.bf16.msra.mxu1 %v2511_v61  ;;  %p2680_p10 = pnand %p2679_p9, %p2673_p6 }
 0x4bf   :  { %1909 = vmatprep.subr.bf16.mxu0 %v2516_v62  ;;  %1950 = vmatprep.subr.bf16.mxu1 %v2519_v63 }
 0x4c2   :  { %1910 = vmatpush1.bf16.msra.mxu0 %v2514_v0  ;;  %1951 = vmatpush1.bf16.msra.mxu1 %v2517_v1  ;;  %v1170_v1 = vrot.slane %v1157_v52, %v2857_v2 }
 0x4c3   :  { %1911 = vmatprep.subr.bf16.mxu0 %v2522_v3  ;;  %1952 = vmatprep.subr.bf16.mxu1 %v2525_v5 }
 0x4c6   :  { %1912 = vmatpush1.bf16.msra.mxu0 %v2520_v6  ;;  %1953 = vmatpush1.bf16.msra.mxu1 %v2523_v7 }
 0x4c7   :  { %1913 = vmatprep.subr.bf16.mxu0 %v2528_v8  ;;  %1954 = vmatprep.subr.bf16.mxu1 %v2531_v10 }
 0x4ca   :  { %1914 = vmatpush1.bf16.msra.mxu0 %v2526_v11  ;;  %1955 = vmatpush1.bf16.msra.mxu1 %v2529_v12 }
 0x4cb   :  { %1915 = vmatprep.subr.bf16.mxu0 %v2534_v15  ;;  %1956 = vmatprep.subr.bf16.mxu1 %v2537_v16 }
 0x4ce   :  { %1916 = vmatpush1.bf16.msra.mxu0 %v2532_v20  ;;  %1957 = vmatpush1.bf16.msra.mxu1 %v2535_v17 }
 0x4cf   :  { %1917 = vmatprep.subr.bf16.mxu0 %v2540_v18  ;;  %1958 = vmatprep.subr.bf16.mxu1 %v2543_v23 }
 0x4d2   :  { %1918 = vmatpush2.bf16.msra.mxu0 %v2538_v24  ;;  %1959 = vmatpush2.bf16.msra.mxu1 %v2541_v25 }
 0x4d3   :  { %1919 = vmatprep.subr.bf16.mxu0 %v2546_v26  ;;  %1960 = vmatprep.subr.bf16.mxu1 %v2549_v27 }
 0x4d6   :  { %1920 = vmatpush2.bf16.msra.mxu0 %v2544_v30  ;;  %1961 = vmatpush2.bf16.msra.mxu1 %v2547_v31 }
 0x4d7   :  { %1921 = vmatprep.subr.bf16.mxu0 %v2552_v32  ;;  %1962 = vmatprep.subr.bf16.mxu1 %v2555_v28 }
 0x4da   :  { %1922 = vmatpush2.bf16.msra.mxu0 %v2550_v33  ;;  %1963 = vmatpush2.bf16.msra.mxu1 %v2553_v29 }
 0x4db   :  { %1923 = vmatprep.subr.bf16.mxu0 %v2558_v34  ;;  %1964 = vmatprep.subr.bf16.mxu1 %v2561_v35 }
 0x4de   :  { %1924 = vmatpush2.bf16.msra.mxu0 %v2556_v9  ;;  %1965 = vmatpush2.bf16.msra.mxu1 %v2559_v36 }
 0x4df   :  { %1925 = vmatprep.subr.bf16.mxu0 %v2564_v13  ;;  %1966 = vmatprep.subr.bf16.mxu1 %v2567_v37 }
 0x4e2   :  { %1926 = vmatpush2.bf16.msra.mxu0 %v2562_v14  ;;  %1967 = vmatpush2.bf16.msra.mxu1 %v2565_v38 }
 0x4e3   :  { %1927 = vmatprep.subr.bf16.mxu0 %v2570_v19  ;;  %1968 = vmatprep.subr.bf16.mxu1 %v2573_v39 }
 0x4e6   :  { %1928 = vmatpush2.bf16.msra.mxu0 %v2568_v40  ;;  %1969 = vmatpush2.bf16.msra.mxu1 %v2571_v41 }
 0x4e7   :  { %1929 = vmatprep.subr.bf16.mxu0 %v2576_v42  ;;  %1970 = vmatprep.subr.bf16.mxu1 %v2579_v43 }
 0x4ea   :  { %1930 = vmatpush2.bf16.msra.mxu0 %v2574_v44  ;;  %1971 = vmatpush2.bf16.msra.mxu1 %v2577_v45 }
 0x4eb   :  { %1931 = vmatprep.subr.bf16.mxu0 %v2582_v46  ;;  %1972 = vmatprep.subr.bf16.mxu1 %v2585_v47 }
 0x4ee   :  { %1932 = vmatpush2.bf16.msra.mxu0 %v2580_v50  ;;  %1973 = vmatpush2.bf16.msra.mxu1 %v2583_v51 }
 0x4f1   :  { %1934 = vmatmul.mubr.bf16.vlgmr.msra.gmra.mxu0 %v2904_v48  ;;  %1975 = vmatmul.mubr.bf16.vlgmr.msra.gmra.mxu1 %v2906_v49 }
 0x571   :  { %v1853_v55 = vpop.f32.mrf.mxu0  ;;  %v1894_v56 = vpop.f32.mrf.mxu1 }
 0x572   :  { %v1854_v57 = vadd.f32 %v1853_v55, %v1162_v53 }
 0x573   :  { %v1855_v58 = vpop.f32.mrf.mxu0  ;;  %v1896_v59 = vpop.f32.mrf.mxu1 }
 0x574   :  { %v1895_v60 = vadd.f32 %v1894_v56, %v1854_v57  ;;  %v1856_v61 = vadd.f32 %v1855_v58, %v1166_v54 }
 0x575   :  { %v1857_v62 = vpop.f32.mrf.mxu0  ;;  %v1898_v63 = vpop.f32.mrf.mxu1 }
 0x576   :  { %1983 = vst [vmem:[#allocation10] sm:$0xff] %v1895_v60  ;;  %v1897_v48 = vadd.f32 %v1896_v59, %v1856_v61 }
 0x577   :  { %v1858_v49 = vpop.f32.mrf.mxu0  ;;  %v1899_v0 = vpop.f32.mrf.mxu1 }
 0x578   :  { %1984 = vst [vmem:[#allocation10 + $0x8] sm:$0xff] %v1897_v48 }
 0x5b1   :  { %v1935_v3 = vpop.f32.mrf.mxu0  ;;  %v1976_v22 = vpop.f32.mrf.mxu1 }
 0x5b2   :  { %v1936_v5 = vadd.f32 %v1935_v3, %v1170_v1 }
 0x5b3   :  { %v1937_v6 = vpop.f32.mrf.mxu0  ;;  %v1978_v7 = vpop.f32.mrf.mxu1 }
 0x5b4   :  { %v1977_v8 = vadd.f32 %v1976_v22, %v1936_v5  ;;  %v1938_v10 = vadd.f32 %v1937_v6, %v1174_v21 }
 0x5b5   :  { %v1939_v11 = vpop.f32.mrf.mxu0  ;;  %v1980_v12 = vpop.f32.mrf.mxu1 }
 0x5b6   :  { %1985 = vst [vmem:[#allocation10 + $0x10] sm:$0xff] %v1977_v8  ;;  %v1979_v15 = vadd.f32 %v1978_v7, %v1938_v10 }
 0x5b7   :  { %v1940_v16 = vpop.f32.mrf.mxu0  ;;  %v1981_v20 = vpop.f32.mrf.mxu1 }
 0x5b8   :  { %1986 = vst [vmem:[#allocation10 + $0x18] sm:$0xff] %v1979_v15 }
 0x5b9   :  { %2683 = shalt.err (!%p2680_p10)
}
 0x5ba   :  { %1996 = dma.vmem_to_hbm [thread:$0]  %s1994_s21, 512, %s2937_s15, [#allocation4]  }
 0x5bb   :  { %2698 = dma.done.wait [#allocation4], 512  }
 0x5bc   :  { %2699 = vsyncadd [#allocation4], 4294966784 }
 0x5bd   :  { %2000 = vsyncpa [#allocation3], 1 }
 0x5be   :  { %2001 = vsyncpa [#allocation6], 1 }
 0x5bf   :  { %2002 = vsyncpa [#allocation9], 1 }
 0x5c0   :  { %2003 = vsyncpa [#allocation4], 1 }

</bundles_post_ra>
